<compile_context>
chip_gen: v7x
topology: tpu7x:2x2x1
jax: 0.10.0
libtpu: 0.0.40
codegen_flags: <defaults>
</compile_context>

<pallas_src>
import jax
import jax.numpy as jnp
from jax.experimental import pallas as pl
from jax.experimental.pallas import tpu as pltpu


def _permute_y_kernel(y_ref, o_ref):
    # y_ref: (1, C, H, W)  ->  o_ref: (1, W, H*C)
    t = jnp.transpose(y_ref[...], (0, 3, 2, 1))      # (1, W, H, C)  (XLU transpose)
    o_ref[...] = t.reshape(o_ref.shape)               # lane-dense store (minor dim H*C)


def _permute_y_pallas(y):
    N, C, H, W = y.shape
    out_flat = pl.pallas_call(
        _permute_y_kernel,
        out_shape=jax.ShapeDtypeStruct((N, W, H * C), y.dtype),
        grid=(N,),
        in_specs=[pl.BlockSpec((1, C, H, W), lambda n: (n, 0, 0, 0))],
        out_specs=pl.BlockSpec((1, W, H * C), lambda n: (n, 0, 0)),
        compiler_params=pltpu.CompilerParams(
            dimension_semantics=("parallel",)),
    )(y)
    # (N, W, H*C) and (N, W, H, C) share the same row-major layout: free reshape.
    return out_flat.reshape(N, W, H, C)


def permute_model(x, y):
    """Pallas equivalent of Model.forward(x, y)."""
    # x's three permutes compose to the identity: no data movement, no kernel.
    out_x = x
    # NOTE: at toy sizes a plain jnp.transpose would beat the pallas_call launch
    # overhead; the Pallas path is kept (and exercised) here as the kernel under test.
    out_y = _permute_y_pallas(y)
    return out_x, out_y


if __name__ == "__main__":
    key = jax.random.PRNGKey(0)
    kx, ky = jax.random.split(key)

    # Small shapes consistent with the module (x is 3-D, y is 4-D NCHW-like).
    x = jax.random.normal(kx, (2, 8, 16), dtype=jnp.float32)
    y = jax.random.normal(ky, (2, 4, 8, 16), dtype=jnp.float32)

    out_x, out_y = permute_model(x, y)
    jax.block_until_ready((out_x, out_y))

    # Reference check against the composed-permutation semantics.
    ref_x = x                                   # identity
    ref_y = jnp.transpose(y, (0, 3, 2, 1))
    assert out_x.shape == ref_x.shape and out_y.shape == ref_y.shape
    assert jnp.array_equal(out_x, ref_x)
    assert jnp.array_equal(out_y, ref_y)

    print("KERNEL_OK")
</pallas_src>

<mosaic_0001>
module attributes {stable_mosaic.version = 11 : i64} {
  func.func @_permute_y_kernel(%arg0: i32, %arg1: memref<1x4x8x16xf32, #tpu.memory_space<vmem>>, %arg2: memref<1x16x32xf32, #tpu.memory_space<vmem>>) attributes {dimension_semantics = [#tpu.dimension_semantics<parallel>], iteration_bounds = array<i64: 2>, scalar_prefetch = 0 : i64, scratch_operands = 0 : i64, tpu.core_type = #tpu.core_type<tc>, window_params = [{transform_indices = @transform_0, window_bounds = array<i64: 1, 4, 8, 16>}, {transform_indices = @transform_1, window_bounds = array<i64: 1, 16, 32>}]} {
    %c0 = arith.constant 0 : index
    %c0_0 = arith.constant 0 : index
    %c0_1 = arith.constant 0 : index
    %c0_2 = arith.constant 0 : index
    %0 = vector.load %arg1[%c0, %c0_0, %c0_1, %c0_2] : memref<1x4x8x16xf32, #tpu.memory_space<vmem>>, vector<1x4x8x16xf32>
    %1 = tpu.transpose %0, [0, 3, 2, 1] : vector<1x4x8x16xf32> -> vector<1x16x8x4xf32>
    %2 = vector.shape_cast %1 : vector<1x16x8x4xf32> to vector<1x16x32xf32>
    %c0_3 = arith.constant 0 : index
    %c0_4 = arith.constant 0 : index
    %c0_5 = arith.constant 0 : index
    %3 = vector.load %arg2[%c0_3, %c0_4, %c0_5] : memref<1x16x32xf32, #tpu.memory_space<vmem>>, vector<1x16x32xf32>
    tpu.vector_store %arg2[%c0_3, %c0_4, %c0_5], %2 {strides = array<i32>} : memref<1x16x32xf32, #tpu.memory_space<vmem>>, vector<1x16x32xf32>,
    return
  }
  func.func @transform_0(%arg0: i32) -> (i32, i32, i32, i32) {
    %c0_i32 = arith.constant 0 : i32
    %c0_i32_0 = arith.constant 0 : i32
    %c0_i32_1 = arith.constant 0 : i32
    %c0_i32_2 = arith.constant 0 : i32
    return %arg0, %c0_i32, %c0_i32_0, %c0_i32_1 : i32, i32, i32, i32
  }
  func.func @transform_1(%arg0: i32) -> (i32, i32, i32) {
    %c0_i32 = arith.constant 0 : i32
    %c0_i32_0 = arith.constant 0 : i32
    %c0_i32_1 = arith.constant 0 : i32
    return %arg0, %c0_i32, %c0_i32_0 : i32, i32, i32
  }
}

</mosaic_0001>

<bundles_post_ra>
// kernel: tpu_custom_call.1
= control target key start
LH: loop header
LB: loop body
LE: loop exit
PB: predicated region body
PF: predicated region fallthrough
CT: control target
= control target key end

     0   :  { %6 = vsyncpa [#allocation3], 0  ;;  %s1807_s0 = inlined_call_operand.hbm [shape: f32[2,4,8,16], index: 0, kind: input, shape index: {}]   ;;  %s1808_s1 = inlined_call_operand.hbm [shape: f32[2,16,32], index: 1, kind: output, shape index: {}]  }
   0x1   :  { %8 = vsyncpa [#allocation3 + $0x1], 0 }
   0x2   :  { %9 = vsyncpa [#allocation4], 0 }
   0x3   :  { %11 = vsyncpa [#allocation4 + $0x1], 0  ;;  %s1552_s6 = smov 0   ;;  %s1554_s7 = smov 0  }
   0x4   :  { %s1556_s8 = smov 0   ;;  %s1558_s9 = smov 0  }
   0x5 LB: > { %s1573_s10 = sadd.s32 4294967295, %s1525_s9   ;;  %s1354_s11 = sadd.s32 4294967294, %s1525_s9   ;;  %s1525_s9 = sphi %s1558_s9, %s1821_s9   ;;  %s1521_s8 = sphi %s1556_s8, %s1820_s8   ;;  %s1517_s7 = sphi %s1554_s7, %s1819_s7   ;;  %s1513_s6 = sphi %s1552_s6, %s1818_s6  }
   0x6   : > { %s1577_s12 = sadd.s32 1, %s1525_s9   ;;  %s24_s13 = sadd.s32 1, %s1521_s8 }
   0x7   : > { %s21_s14 = ssub.s32 %s1525_s9, %s1577_s12  ;;  %p31_p0 = scmp.ne.s32.totalorder %s1521_s8, %s1517_s7 }
   0x8   : > { %p22_p1 = scmp.eq.s32.totalorder %s21_s14, 0  ;;  %p32_p2 = scmp.eq.s32.totalorder %s1525_s9, 0 }
   0x9   : > { %p37_p3 = scmp.ne.s32.totalorder %s1517_s7, %s1513_s6  ;;  %p38_p4 = scmp.eq.s32.totalorder %s1573_s10, 0 }
   0xa   : > { %s1589_s15 = scalar_select %p22_p1, %s1521_s8, %s24_s13  }
   0xb   : > { %p1591_p5 = por %p32_p2, %p31_p0  ;;  %p1595_p6 = por %p38_p4, %p37_p3 }
   0xc   : > { %p61_p7 = scmp.eq.s32.totalorder %s1573_s10, 1  ;;  %p67_p8 = scmp.eq.s32.totalorder %s1354_s11, 1 }
   0xd   : > { %p1382_p10 = scmp.lt.s32.totalorder %s1525_s9, 2  ;;  %s87_s20 = sand.u32 1, %s1521_s8  }
   0xe   : > { %p1602_p11 = por %p61_p7, %p31_p0  ;;  %p1606_p12 = por %p67_p8, %p37_p3 }
   0xf   : > { %s1368_s21 = sshll.u32 %s1525_s9, 9  ;;  %s1357_s22 = sshll.u32 %s87_s20, 5 }
  0x10   : > { %s1812_s18 = scalar_select %p1602_p11, 1, 0 }
  0x11   : > { %s1813_s19 = scalar_select %p1606_p12, 1, 0 }
  0x12   : > { %s1615_s25 = scalar_lea.hbm %s1807_s0, %s1368_s21  ;;  %s91_s26 = scalar_lea.vmem [#allocation2], %s1357_s22 }
  0x13   : > { %s98_s27 = sshll.u32 %s91_s26, 4  ;;  %p1619_p13 = pnand %p1382_p10, %p1591_p5  ;;  %s1623_s27 = int_to_ptr.vmem [resolvable:$true] %s98_s27 }
  0x14   : > { %s1625_s29 = scalar_lea.sflag [#allocation3], %s87_s20  ;;  %s1429_s30 = scalar_lea.hbm %s1615_s25, 512 }
  0x15   : > { %p1430_p0 = scmp.ne.s32.totalorder %s1615_s25, %s1429_s30  ;;  %p1431_p1 = pneg %p1619_p13 }
  0x16   : > { %s1434_s4 = scalar_lea.hbm %s1807_s0, 1024  ;;  %p1435_p4 = scmp.lt.u32.totalorder %s1615_s25, %s1807_s0 }
  0x17   : > { %p1432_p2 = pnand %p1431_p1, %p1430_p0  ;;  %p1436_p5 = scmp.lt.u32.totalorder %s1434_s4, %s1429_s30 }
  0x18   : > { %p1438_p8 = scmp.lt.u32.totalorder %s1429_s30, %s1615_s25 }
  0x19   : > { %p1433_p3 = pneg %p1432_p2  ;;  %p1437_p7 = por %p1436_p5, %p1435_p4 }
  0x1b   : > { %p1439_p10 = por %p1438_p8, %p1437_p7 }
  0x1d   : > { %p1440_p9 = pnand %p1439_p10, %p1433_p3 }
  0x1f   : > { %1443 = shalt.err (!%p1440_p9)
}
  0x20   : > { %s1444_s13 = scalar_lea.vmem %s1623_s27, 512  ;;  %s1527_s14 = smov [#allocation2]  }
  0x21   : > { %p1445_p0 = scmp.ne.s32.totalorder %s1623_s27, %s1444_s13  ;;  %s1449_s16 = sshll.u32 %s1527_s14, 4  ;;  %s1450_s16 = int_to_ptr.vmem [resolvable:$false] %s1449_s16 }
  0x22   : > { %s1451_s20 = scalar_lea.vmem %s1450_s16, 1024  ;;  %p1452_p11 = scmp.lt.s32.totalorder %s1623_s27, %s1450_s16 }
  0x23   : > { %p1447_p2 = pnand %p1445_p0, %p1431_p1  ;;  %p1453_p4 = scmp.lt.s32.totalorder %s1451_s20, %s1444_s13 }
  0x25   : > { %p1448_p12 = pneg %p1447_p2  ;;  %p1454_p5 = por %p1453_p4, %p1452_p11 }
  0x27   : > { %p1455_p7 = pnand %p1454_p5, %p1448_p12 }
  0x29   : > { %1458 = shalt.err (!%p1455_p7)
}
  0x2a   : > { %s1528_s21 = smov 128   ;;  %s1529_s22 = smov 8  }
  0x2b   : > { %1377 = dma.hbm_to_vmem [thread:$0]  (!%p1619_p13), %s1615_s25, 512, %s1623_s27, %s1625_s29, %s1528_s21, %s1528_s21, %s1529_s22  }
  0x2c   : > { %p1360_p9 = scmp.ge.s32.totalorder %s1525_s9, 1  ;;  %p106_p1 = scmp.lt.s32.totalorder %s1525_s9, 3 }
  0x2e   : > { %p107_p3 = pnand %p1360_p9, %p106_p1 }
  0x2f   : > { %s1656_s23 = sand.u32 (!%p107_p3), 1, %s1517_s7  }
  0x30   : > { %110 = sbr.rel (%p107_p3) target bundleno = 518 (0x206), region = 24  ;;  %s1361_s24 = sshll.u32 (!%p107_p3), %s1656_s23, 5 }
  0x31   : > { %s113_s26 = scalar_lea.sflag (!%p107_p3), [#allocation3], %s1656_s23  ;;  %s116_s30 = scalar_lea.vmem (!%p107_p3), [#allocation2], %s1361_s24 }
  0x37   : > { %1504 = dma.done.wait (%p1595_p6), %s113_s26, 512  }
  0x38   : > { %1506 = vsyncadd (%p1595_p6), %s113_s26, 4294966784  ;;  %v137_v0 = vld [vmem:[%s116_s30 + $0x10] sm:$0xff]  ;;  %v135_v1 = vld [vmem:[%s116_s30] sm:$0xff]  ;;  %v1530_v4 = vmov 1983009808   ;;  %v272_v6 = vlaneseq  ;;  %v1532_v34 = vmov 0.0  }
  0x39   : > { %203 = vxpose.xlu1.b32.start.end [1/1] (short) (narrow) %v137_v0, 16  ;;  %139 = vxpose.xlu0.b32.start.end [1/1] (short) (narrow) %v135_v1, 16  ;;  %v138_v2 = vld [vmem:[%s116_s30 + $0x18] sm:$0xff]  ;;  %v136_v3 = vld [vmem:[%s116_s30 + $0x8] sm:$0xff]  ;;  %v270_v5 = vunpack.c.l.s4 %v1530_v4  ;;  %v1531_v11 = vmov 1934713408  }
  0x3a   : > { %v273_v10 = vshrl.u32 %v272_v6, 7  ;;  %v302_v12 = vunpack.c.l.s4 %v1531_v11  ;;  %s1533_s17 = smov 8   ;;  %s1534_s25 = smov 4   ;;  %vm1243_vm0 = vcmask 31744   ;;  %vm1246_vm1 = vcmask 64512  }
  0x3b   : > { %v271_v9 = vunpack.c.0.s8 %v270_v5  ;;  %s1535_s27 = smov 12   ;;  %s1536_s28 = smov 16   ;;  %vm1249_vm2 = vcmask 97280   ;;  %vm1252_vm3 = vcmask 130048   ;;  %vm1255_vm4 = vcmask 162816  }
  0x3c   : > { %v303_v17 = vunpack.c.0.s8 %v302_v12  ;;  %s1537_s29 = smov 20   ;;  %s1538_s2 = smov 24   ;;  %vm1258_vm5 = vcmask 195584   ;;  %vm1261_vm6 = vcmask 228352   ;;  %vm1264_vm7 = vcmask 261120  }
  0x3d   : > { %v1664_v15 = vsub.s32 %v271_v9, %v273_v10  ;;  %s1539_s3 = smov 28   ;;  %s1362_s4 = sshll.u32 %s1656_s23, 4 }
  0x3e   : > { %235 = vxpose.xlu1.b32.start.end [1/1] (short) (narrow) %v138_v2, 16  ;;  %171 = vxpose.xlu0.b32.start.end [1/1] (short) (narrow) %v136_v3, 16  ;;  %v1668_v25 = vsub.s32 %v303_v17, %v273_v10  ;;  %s134_s5 = scalar_lea.vmem [#allocation5], %s1362_s4  ;;  %s1369_s13 = sshll.u32 %s1573_s10, 8 }
  0x3f   : > { %s1281_s11 = sshll.u32 %s134_s5, 4  ;;  %s1761_s20 = scalar_lea.hbm %s1808_s1, %s1369_s13  ;;  %s1755_s11 = int_to_ptr.vmem [resolvable:$true] %s1281_s11 }
  0x40   : > { %s1268_s10 = scalar_lea.sflag [#allocation4], %s1656_s23  ;;  %s1459_s21 = scalar_lea.vmem %s1755_s11, 256 }
  0x41   : > { %p1460_p6 = scmp.ne.s32.totalorder %s1755_s11, %s1459_s21  ;;  %p1815_p11 = scmp.ne.s32.totalorder %s1812_s18, 0 }
  0x42   : > { %s1540_s22 = smov [#allocation5]  }
  0x43   : > { %p1461_p12 = pnand %p1460_p6, %p1815_p11  ;;  %s1463_s24 = sshll.u32 %s1540_s22, 4  ;;  %s1464_s24 = int_to_ptr.vmem [resolvable:$false] %s1463_s24 }
  0x44   : > { %s1465_s26 = scalar_lea.vmem %s1464_s24, 512  ;;  %p1466_p8 = scmp.lt.s32.totalorder %s1755_s11, %s1464_s24 }
  0x45   : > { %p1462_p13 = pneg %p1461_p12  ;;  %p1467_p10 = scmp.lt.s32.totalorder %s1465_s26, %s1459_s21 }
  0x47   : > { %p1468_p0 = por %p1467_p10, %p1466_p8 }
  0x49   : > { %p1469_p2 = pnand %p1468_p0, %p1462_p13 }
  0xb9   : > { %v219_v7 = vpop.trf.xlu1  ;;  %v155_v8 = vpop.trf.xlu0 }
  0xba   : > { %v267_v16 = vcombine.low %v155_v8, %v219_v7  ;;  %v268_v22 = vcombine.high %v155_v8, %v219_v7 }
  0xbc   : > { %v275_v23 = vrot.slane %v267_v16, %v1664_v15  ;;  %v282_v31 = vrot.slane %v268_v22, %v1664_v15 }
  0xbd   : > { %v220_v13 = vpop.trf.xlu1  ;;  %v156_v14 = vpop.trf.xlu0 }
  0xbe   : > { %v335_v38 = vcombine.low %v156_v14, %v220_v13  ;;  %v336_v48 = vcombine.high %v156_v14, %v220_v13 }
  0xc0   : > { %v343_v43 = vrot.slane %v335_v38, %v1664_v15  ;;  %v350_v53 = vrot.slane %v336_v48, %v1664_v15 }
  0xc1   : > { %v251_v18 = vpop.trf.xlu1  ;;  %v187_v19 = vpop.trf.xlu0 }
  0xc2   : > { %v283_v20 = vcombine.low %v187_v19, %v251_v18  ;;  %v284_v21 = vcombine.high %v187_v19, %v251_v18 }
  0xc4   : > { %v291_v24 = vrot.slane %v283_v20, %v1664_v15  ;;  %v298_v26 = vrot.slane %v284_v21, %v1664_v15 }
  0xc5   : > { %v252_v29 = vpop.trf.xlu1  ;;  %v188_v30 = vpop.trf.xlu0 }
  0xc6   : > { %v299_v27 = vcombine.low %v275_v23, %v291_v24  ;;  %v300_v28 = vcombine.high %v275_v23, %v291_v24  ;;  %v351_v33 = vcombine.low %v188_v30, %v252_v29  ;;  %v315_v37 = vcombine.low %v282_v31, %v298_v26 }
  0xc7   : > { %v316_v42 = vcombine.high %v282_v31, %v298_v26  ;;  %v352_v44 = vcombine.high %v188_v30, %v252_v29 }
  0xc8   : > { %v307_v32 = vrot.slane %v299_v27, %v1668_v25  ;;  %v314_v36 = vrot.slane %v300_v28, %v1668_v25  ;;  %v359_v39 = vrot.slane %v351_v33, %v1664_v15  ;;  %v323_v41 = vrot.slane %v315_v37, %v1668_v25 }
  0xc9   : > { %v330_v46 = vrot.slane %v316_v42, %v1668_v25  ;;  %v366_v49 = vrot.slane %v352_v44, %v1664_v15 }
  0xca   : > { %403 = vxpose.xlu0.b32.start.end [1/1] (short) (narrow) %v307_v32, 8  ;;  %v331_v35 = vcombine.high %v307_v32, %v1532_v34  ;;  %v332_v40 = vcombine.high %v314_v36, %v1532_v34  ;;  %v333_v45 = vcombine.high %v323_v41, %v1532_v34  ;;  %v367_v47 = vcombine.low %v343_v43, %v359_v39 }
  0xcb   : > { %v334_v50 = vcombine.high %v330_v46, %v1532_v34  ;;  %v368_v52 = vcombine.high %v343_v43, %v359_v39  ;;  %v383_v56 = vcombine.low %v350_v53, %v366_v49  ;;  %v384_v59 = vcombine.high %v350_v53, %v366_v49 }
  0xcc   : > { %435 = vxpose.xlu1.b32.start.end [1/1] (short) (narrow) %v331_v35, 8  ;;  %v375_v51 = vrot.slane %v367_v47, %v1668_v25 }
  0xcd   : > { %v382_v55 = vrot.slane %v368_v52, %v1668_v25  ;;  %v391_v58 = vrot.slane %v383_v56, %v1668_v25  ;;  %v398_v61 = vrot.slane %v384_v59, %v1668_v25 }
  0xce   : > { %467 = vxpose.xlu0.b32.start.end [1/1] (short) (narrow) %v314_v36, 8  ;;  %v399_v54 = vcombine.high %v375_v51, %v1532_v34 }
  0xcf   : > { %v400_v57 = vcombine.high %v382_v55, %v1532_v34  ;;  %v401_v60 = vcombine.high %v391_v58, %v1532_v34  ;;  %v402_v62 = vcombine.high %v398_v61, %v1532_v34 }
  0xd0   : > { %499 = vxpose.xlu1.b32.start.end [1/1] (short) (narrow) %v332_v40, 8 }
  0xd2   : > { %531 = vxpose.xlu0.b32.start.end [1/1] (short) (narrow) %v323_v41, 8 }
  0xd4   : > { %563 = vxpose.xlu1.b32.start.end [1/1] (short) (narrow) %v333_v45, 8 }
  0xd6   : > { %595 = vxpose.xlu0.b32.start.end [1/1] (short) (narrow) %v330_v46, 8 }
  0xd8   : > { %627 = vxpose.xlu1.b32.start.end [1/1] (short) (narrow) %v334_v50, 8 }
  0xda   : > { %659 = vxpose.xlu0.b32.start.end [1/1] (short) (narrow) %v375_v51, 8 }
  0xdc   : > { %691 = vxpose.xlu1.b32.start.end [1/1] (short) (narrow) %v399_v54, 8 }
  0xde   : > { %723 = vxpose.xlu0.b32.start.end [1/1] (short) (narrow) %v382_v55, 8 }
  0xe0   : > { %755 = vxpose.xlu1.b32.start.end [1/1] (short) (narrow) %v400_v57, 8 }
  0xe2   : > { %787 = vxpose.xlu0.b32.start.end [1/1] (short) (narrow) %v391_v58, 8 }
  0xe4   : > { %819 = vxpose.xlu1.b32.start.end [1/1] (short) (narrow) %v401_v60, 8 }
  0xe6   : > { %851 = vxpose.xlu0.b32.start.end [1/1] (short) (narrow) %v398_v61, 8 }
  0xe8   : > { %883 = vxpose.xlu1.b32.start.end [1/1] (short) (narrow) %v402_v62, 8 }
 0x14a   : > { %v419_v63 = vpop.trf.xlu0 }
 0x14c   : > { %v451_v0 = vpop.trf.xlu1 }
 0x14e   : > { %v483_v1 = vpop.trf.xlu0 }
 0x14f   : > { %v915_v6 = vcombine.low %v419_v63, %v483_v1  ;;  %v916_v23 = vcombine.high %v419_v63, %v483_v1 }
 0x150   : > { %v515_v2 = vpop.trf.xlu1 }
 0x151   : > { %v931_v4 = vcombine.low %v451_v0, %v515_v2  ;;  %v923_v12 = vrot.slane %v915_v6, %v1664_v15  ;;  %v932_v18 = vcombine.high %v451_v0, %v515_v2  ;;  %v1706_v36 = vrot.slane %v916_v23, %v1664_v15 }
 0x152   : > { %v547_v3 = vpop.trf.xlu0 }
 0x153   : > { %v939_v9 = vrot.slane %v931_v4, %v1664_v15  ;;  %v1696_v31 = vrot.slane %v932_v18, %v1664_v15 }
 0x154   : > { %v579_v5 = vpop.trf.xlu1 }
 0x155   : > { %v979_v19 = vcombine.low %v923_v12, %v939_v9  ;;  %v980_v20 = vcombine.high %v923_v12, %v939_v9  ;;  %v995_v42 = vcombine.low %v1706_v36, %v1696_v31 }
 0x156   : > { %v611_v7 = vpop.trf.xlu0 }
 0x157   : > { %v947_v8 = vcombine.low %v547_v3, %v611_v7  ;;  %v948_v21 = vcombine.high %v547_v3, %v611_v7  ;;  %v994_v34 = vrot.slane %v980_v20, %v1668_v25  ;;  %v1703_v35 = vrot.slane %v979_v19, %v1668_v25 }
 0x158   : > { %v643_v10 = vpop.trf.xlu1  ;;  %v1003_v56 = vrot.slane %v995_v42, %v1668_v25  ;;  %v996_v19 = vcombine.high %v1706_v36, %v1696_v31 }
 0x159   : > { %v963_v11 = vcombine.low %v579_v5, %v643_v10  ;;  %v964_v13 = vcombine.high %v579_v5, %v643_v10  ;;  %v955_v16 = vrot.slane %v947_v8, %v1664_v15  ;;  %v1699_v32 = vrot.slane %v948_v21, %v1664_v15 }
 0x15a   : > { %v675_v14 = vpop.trf.xlu0 }
 0x15b   : > { %v971_v17 = vrot.slane %v963_v11, %v1664_v15  ;;  %v1689_v27 = vrot.slane %v964_v13, %v1664_v15 }
 0x15c   : > { %v707_v22 = vpop.trf.xlu1 }
 0x15d   : > { %v1011_v24 = vcombine.low %v955_v16, %v971_v17  ;;  %v1012_v26 = vcombine.high %v955_v16, %v971_v17  ;;  %v1027_v37 = vcombine.low %v1699_v32, %v1689_v27  ;;  %v1028_v16 = vcombine.high %v1699_v32, %v1689_v27 }
 0x15e   : > { %v739_v28 = vpop.trf.xlu0 }
 0x15f   : > { %v1026_v29 = vrot.slane %v1012_v26, %v1668_v25  ;;  %v1693_v30 = vrot.slane %v1011_v24, %v1668_v25  ;;  %v1051_v43 = vcombine.low %v675_v14, %v739_v28  ;;  %v1035_v50 = vrot.slane %v1027_v37, %v1668_v25 }
 0x160   : > { %v771_v33 = vpop.trf.xlu1  ;;  %v1052_v53 = vcombine.high %v675_v14, %v739_v28  ;;  %v1042_v23 = vrot.slane %v1028_v16, %v1668_v25  ;;  %v1010_v26 = vrot.slane %v996_v19, %v1668_v25 }
 0x161   : > { %v1067_v38 = vcombine.low %v707_v22, %v771_v33  ;;  %v1045_v40 = vcombine.low %v994_v34, %v1026_v29  ;;  %v1044_v41 = vcombine.high %v1703_v35, %v1693_v30  ;;  %v1043_v45 = vcombine.low %v1703_v35, %v1693_v30 }
 0x162   : > { %v803_v39 = vpop.trf.xlu0  ;;  %v1068_v46 = vcombine.high %v707_v22, %v771_v33  ;;  %v1046_v49 = vcombine.high %v994_v34, %v1026_v29  ;;  %v1059_v54 = vrot.slane %v1051_v43, %v1664_v15  ;;  %v1047_v62 = vcombine.low %v1003_v56, %v1035_v50 }
 0x163   : > { %1197 = vrot.lane.b32.xlu1 %v1045_v40, %s1533_s17  ;;  %1189 = vrot.lane.b32.xlu0 %v1044_v41, %s1534_s25  ;;  %v1075_v47 = vrot.slane %v1067_v38, %v1664_v15  ;;  %v1066_v3 = vrot.slane %v1052_v53, %v1664_v15  ;;  %v1048_v8 = vcombine.high %v1003_v56, %v1035_v50 }
 0x164   : > { %v835_v44 = vpop.trf.xlu1  ;;  %v1082_v59 = vrot.slane %v1068_v46, %v1664_v15  ;;  %v1049_v29 = vcombine.low %v1010_v26, %v1042_v23  ;;  %v1050_v33 = vcombine.high %v1010_v26, %v1042_v23 }
 0x165   : > { %v1115_v60 = vcombine.low %v1059_v54, %v1075_v47  ;;  %v1116_v61 = vcombine.high %v1059_v54, %v1075_v47 }
 0x166   : > { %v867_v48 = vpop.trf.xlu0  ;;  %v1131_v7 = vcombine.low %v1066_v3, %v1082_v59  ;;  %v1132_v24 = vcombine.high %v1066_v3, %v1082_v59 }
 0x167   : > { %v1083_v51 = vcombine.low %v803_v39, %v867_v48  ;;  %v1084_v52 = vcombine.high %v803_v39, %v867_v48  ;;  %1205 = vrot.lane.b32.xlu1 %v1046_v49, %s1535_s27  ;;  %v1130_v9 = vrot.slane %v1116_v61, %v1668_v25  ;;  %v1123_v11 = vrot.slane %v1115_v60, %v1668_v25 }
 0x168   : > { %v899_v55 = vpop.trf.xlu1  ;;  %v1139_v18 = vrot.slane %v1131_v7, %v1668_v25  ;;  %v1146_v31 = vrot.slane %v1132_v24, %v1668_v25 }
 0x169   : > { %v1099_v57 = vcombine.low %v835_v44, %v899_v55  ;;  %v1100_v58 = vcombine.high %v835_v44, %v899_v55  ;;  %v1091_v63 = vrot.slane %v1083_v51, %v1664_v15  ;;  %v1098_v0 = vrot.slane %v1084_v52, %v1664_v15 }
 0x16b   : > { %v1107_v1 = vrot.slane %v1099_v57, %v1664_v15  ;;  %v1114_v2 = vrot.slane %v1100_v58, %v1664_v15  ;;  %1213 = vrot.lane.b32.xlu1 %v1047_v62, %s1536_s28 }
 0x16d   : > { %v1147_v4 = vcombine.low %v1091_v63, %v1107_v1  ;;  %v1148_v5 = vcombine.high %v1091_v63, %v1107_v1  ;;  %v1163_v6 = vcombine.low %v1098_v0, %v1114_v2  ;;  %v1164_v20 = vcombine.high %v1098_v0, %v1114_v2 }
 0x16f   : > { %v1162_v10 = vrot.slane %v1148_v5, %v1668_v25  ;;  %v1155_v12 = vrot.slane %v1147_v4, %v1668_v25  ;;  %1221 = vrot.lane.b32.xlu1 %v1048_v8, %s1537_s29  ;;  %v1171_v15 = vrot.slane %v1163_v6, %v1668_v25  ;;  %v1178_v28 = vrot.slane %v1164_v20, %v1668_v25 }
 0x171   : > { %v1182_v13 = vcombine.high %v1130_v9, %v1162_v10  ;;  %v1180_v14 = vcombine.high %v1123_v11, %v1155_v12  ;;  %v1179_v17 = vcombine.low %v1123_v11, %v1155_v12  ;;  %v1183_v21 = vcombine.low %v1139_v18, %v1171_v15 }
 0x172   : > { %v1181_v22 = vcombine.low %v1130_v9, %v1162_v10  ;;  %v1184_v27 = vcombine.high %v1139_v18, %v1171_v15  ;;  %v1185_v32 = vcombine.low %v1146_v31, %v1178_v28  ;;  %v1186_v34 = vcombine.high %v1146_v31, %v1178_v28 }
 0x173   : > { %1207 = vrot.lane.b32.xlu0 %v1182_v13, %s1535_s27  ;;  %1191 = vrot.lane.b32.xlu1 %v1180_v14, %s1534_s25 }
 0x177   : > { %1215 = vrot.lane.b32.xlu0 %v1183_v21, %s1536_s28  ;;  %1199 = vrot.lane.b32.xlu1 %v1181_v22, %s1533_s17 }
 0x17b   : > { %1223 = vrot.lane.b32.xlu0 %v1184_v27, %s1537_s29  ;;  %1229 = vrot.lane.b32.xlu1 %v1049_v29, %s1538_s2 }
 0x17f   : > { %1231 = vrot.lane.b32.xlu0 %v1185_v32, %s1538_s2  ;;  %1237 = vrot.lane.b32.xlu1 %v1050_v33, %s1539_s3 }
 0x183   : > { %1239 = vrot.lane.b32.xlu0 %v1186_v34, %s1539_s3 }
 0x1d5   : > { %v1198_v36 = vpop.permute.xlu1 %1197  ;;  %v1190_v39 = vpop.permute.xlu0 %1189 }
 0x1d6   : > { %v1244_v46 = vsel %vm1243_vm0, %v1043_v45, %v1190_v39 }
 0x1d7   : > { %v1247_v49 = vsel %vm1246_vm1, %v1244_v46, %v1198_v36 }
 0x1d9   : > { %v1206_v37 = vpop.permute.xlu1 %1205 }
 0x1da   : > { %v1250_v52 = vsel %vm1249_vm2, %v1247_v49, %v1206_v37 }
 0x1dd   : > { %v1214_v38 = vpop.permute.xlu1 %1213 }
 0x1de   : > { %v1253_v53 = vsel %vm1252_vm3, %v1250_v52, %v1214_v38 }
 0x1e1   : > { %v1222_v40 = vpop.permute.xlu1 %1221 }
 0x1e2   : > { %v1256_v54 = vsel %vm1255_vm4, %v1253_v53, %v1222_v40 }
 0x1e5   : > { %v1208_v41 = vpop.permute.xlu0 %1207  ;;  %v1192_v42 = vpop.permute.xlu1 %1191 }
 0x1e6   : > { %v1245_v25 = vsel %vm1243_vm0, %v1179_v17, %v1192_v42 }
 0x1e9   : > { %v1216_v43 = vpop.permute.xlu0 %1215  ;;  %v1200_v44 = vpop.permute.xlu1 %1199 }
 0x1ea   : > { %v1248_v47 = vsel %vm1246_vm1, %v1245_v25, %v1200_v44 }
 0x1eb   : > { %v1251_v50 = vsel %vm1249_vm2, %v1248_v47, %v1208_v41 }
 0x1ec   : > { %v1254_v55 = vsel %vm1252_vm3, %v1251_v50, %v1216_v43 }
 0x1ed   : > { %v1224_v48 = vpop.permute.xlu0 %1223  ;;  %v1230_v51 = vpop.permute.xlu1 %1229 }
 0x1ee   : > { %v1259_v35 = vsel %vm1258_vm5, %v1256_v54, %v1230_v51  ;;  %v1257_v57 = vsel %vm1255_vm4, %v1254_v55, %v1224_v48 }
 0x1f1   : > { %v1232_v30 = vpop.permute.xlu0 %1231  ;;  %v1238_v45 = vpop.permute.xlu1 %1237 }
 0x1f2   : > { %v1262_v56 = vsel %vm1261_vm6, %v1259_v35, %v1238_v45  ;;  %v1260_v58 = vsel %vm1258_vm5, %v1257_v57, %v1232_v30 }
 0x1f3   : > { %1265 = vst.msk [vmem:[%s134_s5] sm:$0xff] %vm1264_vm7, %v1262_v56 }
 0x1f5   : > { %v1240_v59 = vpop.permute.xlu0 %1239 }
 0x1f6   : > { %v1263_v60 = vsel %vm1261_vm6, %v1260_v58, %v1240_v59 }
 0x1f7   : > { %1266 = vst.msk [vmem:[%s134_s5 + $0x8] sm:$0xff] %vm1264_vm7, %v1263_v60 }
 0x1f8   : > { %1472 = shalt.err (!%p1469_p2)
}
 0x1f9   : > { %s1473_s30 = scalar_lea.hbm %s1761_s20, 256  ;;  %s1477_s28 = scalar_lea.hbm %s1808_s1, 512 }
 0x1fa   : > { %p1474_p4 = scmp.ne.s32.totalorder %s1761_s20, %s1473_s30  ;;  %p1478_p9 = scmp.lt.u32.totalorder %s1761_s20, %s1808_s1 }
 0x1fb   : > { %p1479_p1 = scmp.lt.u32.totalorder %s1477_s28, %s1473_s30  ;;  %p1481_p6 = scmp.lt.u32.totalorder %s1473_s30, %s1761_s20 }
 0x1fc   : > { %p1475_p5 = pnand %p1474_p4, %p1815_p11 }
 0x1fd   : > { %p1480_p3 = por %p1479_p1, %p1478_p9 }
 0x1fe   : > { %p1476_p7 = pneg %p1475_p5 }
 0x1ff   : > { %p1482_p12 = por %p1481_p6, %p1480_p3 }
 0x201   : > { %p1483_p13 = pnand %p1482_p12, %p1476_p7 }
 0x203   : > { %1486 = shalt.err (!%p1483_p13)
}
 0x204   : > { %s1541_s3 = smov 128  }
 0x205   : > { %1372 = dma.vmem_to_hbm [thread:$0]  (%p1815_p11), %s1755_s11, 256, %s1761_s20, %s1268_s10, %s1541_s3, %s1541_s3, %s1533_s17  }
 0x206 PF: > { %s1296_s4 = sand.u32 1, %s1513_s6   ;;  %p1816_p8 = scmp.ne.s32.totalorder %s1813_s19, 0 }
 0x207   : > { %p1817_p10 = scmp.ge.s32.totalorder %s1525_s9, 2  ;;  %s1297_s5 = scalar_lea.sflag [#allocation4], %s1296_s4 }
 0x209   : > { %p1379_p0 = pnand %p1817_p10, %p1816_p8 }
 0x20b   : > { %1508 = dma.done.wait (!%p1379_p0), %s1297_s5, 256  }
 0x20c   : > { %1510 = vsyncadd (!%p1379_p0), %s1297_s5, 4294967040  ;;  %p14_p2 = scmp.ge.s32.totalorder %s1577_s12, 4   ;;  %s1818_s6 = smov %s1517_s7 }
 0x20d   : > { %s1819_s7 = smov %s1521_s8  ;;  %s1820_s8 = smov %s1589_s15 }
 0x20e   : > { %s1821_s9 = smov %s1577_s12  ;;  %16 = sbr.rel (!%p14_p2) target bundleno = 5 (0x5), region = 69 }
 0x215   :  { %1302 = vsyncpa [#allocation3], 1 }
 0x216   :  { %1304 = vsyncpa [#allocation3 + $0x1], 1 }
 0x217   :  { %1305 = vsyncpa [#allocation4], 1 }
 0x218   :  { %1307 = vsyncpa [#allocation4 + $0x1], 1 }

</bundles_post_ra>
